<compile_context>
chip_gen: v7x
topology: tpu7x:2x2x1
jax: 0.10.0
libtpu: 0.0.40
codegen_flags: <defaults>
</compile_context>

<pallas_src>
import jax
import jax.numpy as jnp
from jax import lax
from jax.experimental import pallas as pl
from jax.experimental.pallas import tpu as pltpu


def _make_tuner_kernel(dim, vpu_tail):
    d1, d2, d3 = dim // 2, dim // 4, dim // 8

    def kernel(x_ref,                     # (tile_b, dim)  native dtype, VMEM
               w1_ref, b1_ref,            # (d1, dim) VMEM, (d1, 1) f32 VMEM
               w2_ref, b2_ref,            # (d2, d1) VMEM,  (d2, 1) f32 VMEM
               w3_ref, b3_ref,            # vpu_tail: SMEM (d3,d2)/(d3,)  else VMEM (d3,d2)/(d3,1)
               w4_ref, b4_ref,            # vpu_tail: SMEM (d3,)/(1,)     else VMEM (1,d3), SMEM (1,)
               o_ref):                    # (1, tile_b)
        # Layer 1: contract over `dim` directly on the (tile_b, dim) block, so
        # the wrapper never materializes x^T in HBM. The cast to the MXU dtype
        # (bf16 path) is done here on the VPU, keeping HBM traffic at 4 B/elem.
        x = x_ref[...].astype(w1_ref.dtype)
        h = lax.dot_general(w1_ref[...], x,
                            dimension_numbers=(((1,), (1,)), ((), ())),
                            preferred_element_type=jnp.float32)    # (d1, tile_b)
        h = jnp.maximum(h + b1_ref[...], 0.0)

        # Layer 2: standard MXU orientation, batch stays on lanes.
        h = jnp.dot(w2_ref[...], h.astype(w2_ref.dtype),
                    preferred_element_type=jnp.float32)            # (d2, tile_b)
        h = jnp.maximum(h + b2_ref[...], 0.0)

        if vpu_tail:
            # Layers 3 + 4 use <1% of the MXU; run them as scalar(SMEM) x row
            # multiply-adds on the VPU (f32), fused so the (d3, tile_b)
            # intermediate is never materialized. beta is folded into w4/b4.
            acc4 = None
            for o in range(d3):
                r = h[0:1, :] * w3_ref[o, 0]
                for k in range(1, d2):
                    r = r + h[k:k + 1, :] * w3_ref[o, k]
                r = jnp.maximum(r + b3_ref[o], 0.0)                # relu(layer3 row)
                t = r * w4_ref[o]
                acc4 = t if acc4 is None else acc4 + t
            o_ref[...] = (acc4 + b4_ref[0]).astype(o_ref.dtype)
        else:
            h = jnp.dot(w3_ref[...], h.astype(w3_ref.dtype),
                        preferred_element_type=jnp.float32)        # (d3, tile_b)
            h = jnp.maximum(h + b3_ref[...], 0.0)
            h = jnp.dot(w4_ref[...], h.astype(w4_ref.dtype),
                        preferred_element_type=jnp.float32)        # (1, tile_b)
            o_ref[...] = (h + b4_ref[0]).astype(o_ref.dtype)

    return kernel


def basic_tuner_forward(x, params, *, tile_b=None, mxu_dtype=None):
    """BasicTuner forward. x: (B, dim); returns (B, 1).

    params: PyTorch-layout weights w{1..4,b}: (out, in), biases b{1..4,b}: (out,).
    mxu_dtype: optionally run the MXU with e.g. jnp.bfloat16 operands (fine on
    v5e/v6e/v7x -- the MXU is bf16-native); bias adds, ReLU and accumulation
    stay f32. The cast happens in-kernel, so HBM still streams x in its native
    dtype exactly once.
    """
    B, dim = x.shape
    out_dtype = x.dtype
    d1, d2, d3 = dim // 2, dim // 4, dim // 8
    assert d3 >= 1, "dim must be >= 8"

    mdt = jnp.dtype(mxu_dtype) if mxu_dtype is not None else x.dtype

    # --- Per-generation VMEM budget & lane-tile selection -------------------
    try:
        vmem_cap = int(pltpu.get_tpu_info().vmem_capacity_bytes)
    except Exception:
        vmem_cap = 64 << 20                      # conservative (v7x-sized)
    vmem_budget = int(min(vmem_cap // 2, 64 << 20))

    x_row_bytes = dim * x.dtype.itemsize
    out_row_bytes = jnp.dtype(out_dtype).itemsize
    # Double-buffered streamed tiles (x in, out) take at most ~half the budget.
    max_tile = (vmem_budget // 2) // (2 * (x_row_bytes + out_row_bytes))
    max_tile = max(128, min(8192, (max_tile // 128) * 128))

    if tile_b is None:
        if B % 128 != 0:
            tile_b = B                            # tiny/ragged batch: 1 step
        elif B % 256 == 0 and B // 2 <= max_tile:
            tile_b = B // 2                       # 2 big lane-dense steps (v7x megacore)
        else:
            tile_b = min(B, max_tile)
            while B % tile_b != 0:                # keep an even grid
                tile_b -= 128
    assert B % tile_b == 0, (B, tile_b)
    assert tile_b % 128 == 0 or tile_b == B, \
        "tile_b must be a multiple of 128 (lane axis) or the full batch"
    assert 2 * tile_b * (x_row_bytes + out_row_bytes) <= vmem_budget, \
        "shrink tile_b for this dim / VMEM budget"

    # Tiny tail layers go to the VPU when they would waste the MXU.
    vpu_tail = (d2 * d3) <= 128 and d3 <= 16

    # --- Operands (PyTorch-native (out, in) weights) -------------------------
    w1 = params["w1"].astype(mdt)
    w2 = params["w2"].astype(mdt)
    b1 = params["b1"].reshape(-1, 1).astype(jnp.float32)
    b2 = params["b2"].reshape(-1, 1).astype(jnp.float32)

    # Fold beta = Linear(1, 1) into layer4:  beta(y) = wb*y + bb.
    wb = params["wb"][0, 0]
    bb = params["bb"][0]
    b4 = (params["b4"] * wb + bb).reshape(1).astype(jnp.float32)   # scalar, SMEM

    full_vmem = lambda a: pl.BlockSpec(a.shape, lambda i: (0, 0))
    smem = lambda: pl.BlockSpec(memory_space=pltpu.MemorySpace.SMEM)

    if vpu_tail:
        w3 = params["w3"].astype(jnp.float32)                      # (d3, d2) SMEM
        b3 = params["b3"].astype(jnp.float32)                      # (d3,)    SMEM
        w4 = (params["w4"] * wb).reshape(-1).astype(jnp.float32)   # (d3,)    SMEM
        w3_spec, b3_spec, w4_spec = smem(), smem(), smem()
    else:
        w3 = params["w3"].astype(mdt)                              # (d3, d2) VMEM
        b3 = params["b3"].reshape(-1, 1).astype(jnp.float32)       # (d3, 1)  VMEM
        w4 = (params["w4"] * wb).astype(mdt)                       # (1, d3)  VMEM
        w3_spec, b3_spec, w4_spec = full_vmem(w3), full_vmem(b3), full_vmem(w4)

    flops = 2 * B * (dim * d1 + d1 * d2 + d2 * d3 + d3)
    param_bytes = sum(int(a.size) * a.dtype.itemsize
                      for a in (w1, b1, w2, b2, w3, b3, w4, b4))
    bytes_accessed = (int(x.size) * x.dtype.itemsize
                      + B * jnp.dtype(out_dtype).itemsize + param_bytes)

    kernel = _make_tuner_kernel(dim, vpu_tail)

    out = pl.pallas_call(
        kernel,
        out_shape=jax.ShapeDtypeStruct((1, B), out_dtype),
        grid=(B // tile_b,),
        in_specs=[
            pl.BlockSpec((tile_b, dim), lambda i: (i, 0)),         # x streamed
            full_vmem(w1), full_vmem(b1),
            full_vmem(w2), full_vmem(b2),
            w3_spec, b3_spec,
            w4_spec,
            smem(),                                                # folded b4
        ],
        out_specs=pl.BlockSpec((1, tile_b), lambda i: (0, i)),     # lane-dense
        compiler_params=pltpu.CompilerParams(
            dimension_semantics=("parallel",),
            vmem_limit_bytes=vmem_budget),
        cost_estimate=pl.CostEstimate(flops=flops, transcendentals=0,
                                      bytes_accessed=bytes_accessed),
    )(x, w1, b1, w2, b2, w3, b3, w4, b4)

    # Module returns (B, 1); consumers that accept (1, B) / (B,) can skip this.
    return out.reshape(B, 1)


def init_params(key, dim):
    """PyTorch-layout params: weights (out, in), biases (out,). U(+-1/sqrt(in))."""
    sizes = [(dim // 2, dim), (dim // 4, dim // 2),
             (dim // 8, dim // 4), (1, dim // 8), (1, 1)]
    names = ["1", "2", "3", "4", "b"]
    params = {}
    for (fan_out, fan_in), name in zip(sizes, names):
        key, kw, kb = jax.random.split(key, 3)
        bound = 1.0 / float(fan_in) ** 0.5
        params[f"w{name}"] = jax.random.uniform(
            kw, (fan_out, fan_in), jnp.float32, -bound, bound)
        params[f"b{name}"] = jax.random.uniform(
            kb, (fan_out,), jnp.float32, -bound, bound)
    return params


def reference_forward(x, params):
    """Pure-JAX reference matching the PyTorch module (encoder = identity)."""
    h = jnp.maximum(x @ params["w1"].T + params["b1"], 0.0)
    h = jnp.maximum(h @ params["w2"].T + params["b2"], 0.0)
    h = jnp.maximum(h @ params["w3"].T + params["b3"], 0.0)
    h = h @ params["w4"].T + params["b4"]
    return h @ params["wb"].T + params["bb"]


if __name__ == "__main__":
    key = jax.random.PRNGKey(0)

    # Small demo consistent with the module: dim=32 -> hidden 16 / 8 / 4 / 1.
    dim, batch = 32, 512
    key, kx, kp = jax.random.split(key, 3)
    x = jax.random.normal(kx, (batch, dim), jnp.float32)
    params = init_params(kp, dim)
    ref = reference_forward(x, params)

    # f32 path (matches the PyTorch-equivalent reference), VPU tail.
    out = jax.block_until_ready(basic_tuner_forward(x, params))
    assert out.shape == (batch, 1), out.shape
    assert jnp.allclose(out, ref, atol=1e-3, rtol=1e-3), \
        float(jnp.max(jnp.abs(out - ref)))

    # bf16 MXU-operand path (valid on v5e/v6e/v7x), in-kernel cast, f32 accum.
    out_bf16 = jax.block_until_ready(
        basic_tuner_forward(x, params, mxu_dtype=jnp.bfloat16))
    assert jnp.allclose(out_bf16, ref, atol=1e-1, rtol=1e-1), \
        float(jnp.max(jnp.abs(out_bf16 - ref)))

    # Larger-dim config exercises the all-MXU tail (layers 3/4 on the MXU).
    dim2, batch2 = 128, 256
    key, kx2, kp2 = jax.random.split(key, 3)
    x2 = jax.random.normal(kx2, (batch2, dim2), jnp.float32)
    params2 = init_params(kp2, dim2)
    ref2 = reference_forward(x2, params2)
    out2 = jax.block_until_ready(basic_tuner_forward(x2, params2))
    assert out2.shape == (batch2, 1), out2.shape
    assert jnp.allclose(out2, ref2, atol=1e-3, rtol=1e-3), \
        float(jnp.max(jnp.abs(out2 - ref2)))

    print("KERNEL_OK")
</pallas_src>

<mosaic_0001>
module attributes {stable_mosaic.version = 11 : i64} {
  func.func @kernel(%arg0: i32, %arg1: memref<256x32xf32, #tpu.memory_space<vmem>>, %arg2: memref<16x32xf32, #tpu.memory_space<vmem>>, %arg3: memref<16x1xf32, #tpu.memory_space<vmem>>, %arg4: memref<8x16xf32, #tpu.memory_space<vmem>>, %arg5: memref<8x1xf32, #tpu.memory_space<vmem>>, %arg6: memref<4x8xf32, #tpu.memory_space<smem>>, %arg7: memref<4xf32, #tpu.memory_space<smem>>, %arg8: memref<4xf32, #tpu.memory_space<smem>>, %arg9: memref<1xf32, #tpu.memory_space<smem>>, %arg10: memref<1x256xf32, #tpu.memory_space<vmem>>) attributes {dimension_semantics = [#tpu.dimension_semantics<parallel>], iteration_bounds = array<i64: 2>, scalar_prefetch = 0 : i64, scratch_operands = 0 : i64, tpu.core_type = #tpu.core_type<tc>, window_params = [{transform_indices = @transform_0, window_bounds = array<i64: 256, 32>}, {pipeline_mode = #tpu.pipeline_mode<synchronous>, transform_indices = @transform_1, window_bounds = array<i64: 16, 32>}, {pipeline_mode = #tpu.pipeline_mode<synchronous>, transform_indices = @transform_2, window_bounds = array<i64: 16, 1>}, {pipeline_mode = #tpu.pipeline_mode<synchronous>, transform_indices = @transform_3, window_bounds = array<i64: 8, 16>}, {pipeline_mode = #tpu.pipeline_mode<synchronous>, transform_indices = @transform_4, window_bounds = array<i64: 8, 1>}, {transform_indices = @transform_5, window_bounds = array<i64: 4, 8>}, {transform_indices = @transform_6, window_bounds = array<i64: 4>}, {transform_indices = @transform_7, window_bounds = array<i64: 4>}, {transform_indices = @transform_8, window_bounds = array<i64: 1>}, {transform_indices = @transform_9, window_bounds = array<i64: 1, 256>}]} {
    %c0 = arith.constant 0 : index
    %c0_0 = arith.constant 0 : index
    %0 = vector.load %arg1[%c0, %c0_0] : memref<256x32xf32, #tpu.memory_space<vmem>>, vector<256x32xf32>
    %c0_1 = arith.constant 0 : index
    %c0_2 = arith.constant 0 : index
    %1 = vector.load %arg2[%c0_1, %c0_2] : memref<16x32xf32, #tpu.memory_space<vmem>>, vector<16x32xf32>
    %cst = arith.constant dense<0.000000e+00> : vector<16x256xf32>
    %2 = tpu.matmul %1, %0, %cst {dimension_numbers = #tpu.dot_dimension_numbers<[1], [1], [0], [0], [0, 0, 1, 0], [], []>} : vector<16x32xf32>, vector<256x32xf32>, vector<16x256xf32> -> vector<16x256xf32>
    %c0_3 = arith.constant 0 : index
    %c0_4 = arith.constant 0 : index
    %3 = vector.load %arg3[%c0_3, %c0_4] : memref<16x1xf32, #tpu.memory_space<vmem>>, vector<16x1xf32>
    %4 = vector.broadcast %3 : vector<16x1xf32> to vector<16x256xf32>
    %5 = arith.addf %2, %4 : vector<16x256xf32>
    %cst_5 = arith.constant 0.000000e+00 : f32
    %6 = vector.broadcast %cst_5 : f32 to vector<16x256xf32>
    %7 = arith.maximumf %5, %6 : vector<16x256xf32>
    %c0_6 = arith.constant 0 : index
    %c0_7 = arith.constant 0 : index
    %8 = vector.load %arg4[%c0_6, %c0_7] : memref<8x16xf32, #tpu.memory_space<vmem>>, vector<8x16xf32>
    %cst_8 = arith.constant dense<0.000000e+00> : vector<8x256xf32>
    %9 = tpu.matmul %8, %7, %cst_8 {dimension_numbers = #tpu.dot_dimension_numbers<[1], [0], [0], [1], [0, 0, 1, 1], [], []>} : vector<8x16xf32>, vector<16x256xf32>, vector<8x256xf32> -> vector<8x256xf32>
    %c0_9 = arith.constant 0 : index
    %c0_10 = arith.constant 0 : index
    %10 = vector.load %arg5[%c0_9, %c0_10] : memref<8x1xf32, #tpu.memory_space<vmem>>, vector<8x1xf32>
    %11 = vector.broadcast %10 : vector<8x1xf32> to vector<8x256xf32>
    %12 = arith.addf %9, %11 : vector<8x256xf32>
    %cst_11 = arith.constant 0.000000e+00 : f32
    %13 = vector.broadcast %cst_11 : f32 to vector<8x256xf32>
    %14 = arith.maximumf %12, %13 : vector<8x256xf32>
    %15 = vector.extract_strided_slice %14 {offsets = [0, 0], sizes = [1, 256], strides = [1, 1]} : vector<8x256xf32> to vector<1x256xf32>
    %c0_12 = arith.constant 0 : index
    %c0_13 = arith.constant 0 : index
    %16 = memref.load %arg6[%c0_12, %c0_13] : memref<4x8xf32, #tpu.memory_space<smem>>
    %17 = vector.broadcast %16 : f32 to vector<1x256xf32>
    %18 = arith.mulf %15, %17 : vector<1x256xf32>
    %19 = vector.extract_strided_slice %14 {offsets = [1, 0], sizes = [1, 256], strides = [1, 1]} : vector<8x256xf32> to vector<1x256xf32>
    %c0_14 = arith.constant 0 : index
    %c1 = arith.constant 1 : index
    %20 = memref.load %arg6[%c0_14, %c1] : memref<4x8xf32, #tpu.memory_space<smem>>
    %21 = vector.broadcast %20 : f32 to vector<1x256xf32>
    %22 = arith.mulf %19, %21 : vector<1x256xf32>
    %23 = arith.addf %18, %22 : vector<1x256xf32>
    %24 = vector.extract_strided_slice %14 {offsets = [2, 0], sizes = [1, 256], strides = [1, 1]} : vector<8x256xf32> to vector<1x256xf32>
    %c0_15 = arith.constant 0 : index
    %c2 = arith.constant 2 : index
    %25 = memref.load %arg6[%c0_15, %c2] : memref<4x8xf32, #tpu.memory_space<smem>>
    %26 = vector.broadcast %25 : f32 to vector<1x256xf32>
    %27 = arith.mulf %24, %26 : vector<1x256xf32>
    %28 = arith.addf %23, %27 : vector<1x256xf32>
    %29 = vector.extract_strided_slice %14 {offsets = [3, 0], sizes = [1, 256], strides = [1, 1]} : vector<8x256xf32> to vector<1x256xf32>
    %c0_16 = arith.constant 0 : index
    %c3 = arith.constant 3 : index
    %30 = memref.load %arg6[%c0_16, %c3] : memref<4x8xf32, #tpu.memory_space<smem>>
    %31 = vector.broadcast %30 : f32 to vector<1x256xf32>
    %32 = arith.mulf %29, %31 : vector<1x256xf32>
    %33 = arith.addf %28, %32 : vector<1x256xf32>
    %34 = vector.extract_strided_slice %14 {offsets = [4, 0], sizes = [1, 256], strides = [1, 1]} : vector<8x256xf32> to vector<1x256xf32>
    %c0_17 = arith.constant 0 : index
    %c4 = arith.constant 4 : index
    %35 = memref.load %arg6[%c0_17, %c4] : memref<4x8xf32, #tpu.memory_space<smem>>
    %36 = vector.broadcast %35 : f32 to vector<1x256xf32>
    %37 = arith.mulf %34, %36 : vector<1x256xf32>
    %38 = arith.addf %33, %37 : vector<1x256xf32>
    %39 = vector.extract_strided_slice %14 {offsets = [5, 0], sizes = [1, 256], strides = [1, 1]} : vector<8x256xf32> to vector<1x256xf32>
    %c0_18 = arith.constant 0 : index
    %c5 = arith.constant 5 : index
    %40 = memref.load %arg6[%c0_18, %c5] : memref<4x8xf32, #tpu.memory_space<smem>>
    %41 = vector.broadcast %40 : f32 to vector<1x256xf32>
    %42 = arith.mulf %39, %41 : vector<1x256xf32>
    %43 = arith.addf %38, %42 : vector<1x256xf32>
    %44 = vector.extract_strided_slice %14 {offsets = [6, 0], sizes = [1, 256], strides = [1, 1]} : vector<8x256xf32> to vector<1x256xf32>
    %c0_19 = arith.constant 0 : index
    %c6 = arith.constant 6 : index
    %45 = memref.load %arg6[%c0_19, %c6] : memref<4x8xf32, #tpu.memory_space<smem>>
    %46 = vector.broadcast %45 : f32 to vector<1x256xf32>
    %47 = arith.mulf %44, %46 : vector<1x256xf32>
    %48 = arith.addf %43, %47 : vector<1x256xf32>
    %49 = vector.extract_strided_slice %14 {offsets = [7, 0], sizes = [1, 256], strides = [1, 1]} : vector<8x256xf32> to vector<1x256xf32>
    %c0_20 = arith.constant 0 : index
    %c7 = arith.constant 7 : index
    %50 = memref.load %arg6[%c0_20, %c7] : memref<4x8xf32, #tpu.memory_space<smem>>
    %51 = vector.broadcast %50 : f32 to vector<1x256xf32>
    %52 = arith.mulf %49, %51 : vector<1x256xf32>
    %53 = arith.addf %48, %52 : vector<1x256xf32>
    %c0_21 = arith.constant 0 : index
    %54 = memref.load %arg7[%c0_21] : memref<4xf32, #tpu.memory_space<smem>>
    %55 = vector.broadcast %54 : f32 to vector<1x256xf32>
    %56 = arith.addf %53, %55 : vector<1x256xf32>
    %cst_22 = arith.constant 0.000000e+00 : f32
    %57 = vector.broadcast %cst_22 : f32 to vector<1x256xf32>
    %58 = arith.maximumf %56, %57 : vector<1x256xf32>
    %c0_23 = arith.constant 0 : index
    %59 = memref.load %arg8[%c0_23] : memref<4xf32, #tpu.memory_space<smem>>
    %60 = vector.broadcast %59 : f32 to vector<1x256xf32>
    %61 = arith.mulf %58, %60 : vector<1x256xf32>
    %62 = vector.extract_strided_slice %14 {offsets = [0, 0], sizes = [1, 256], strides = [1, 1]} : vector<8x256xf32> to vector<1x256xf32>
    %c1_24 = arith.constant 1 : index
    %c0_25 = arith.constant 0 : index
    %63 = memref.load %arg6[%c1_24, %c0_25] : memref<4x8xf32, #tpu.memory_space<smem>>
    %64 = vector.broadcast %63 : f32 to vector<1x256xf32>
    %65 = arith.mulf %62, %64 : vector<1x256xf32>
    %66 = vector.extract_strided_slice %14 {offsets = [1, 0], sizes = [1, 256], strides = [1, 1]} : vector<8x256xf32> to vector<1x256xf32>
    %c1_26 = arith.constant 1 : index
    %c1_27 = arith.constant 1 : index
    %67 = memref.load %arg6[%c1_26, %c1_27] : memref<4x8xf32, #tpu.memory_space<smem>>
    %68 = vector.broadcast %67 : f32 to vector<1x256xf32>
    %69 = arith.mulf %66, %68 : vector<1x256xf32>
    %70 = arith.addf %65, %69 : vector<1x256xf32>
    %71 = vector.extract_strided_slice %14 {offsets = [2, 0], sizes = [1, 256], strides = [1, 1]} : vector<8x256xf32> to vector<1x256xf32>
    %c1_28 = arith.constant 1 : index
    %c2_29 = arith.constant 2 : index
    %72 = memref.load %arg6[%c1_28, %c2_29] : memref<4x8xf32, #tpu.memory_space<smem>>
    %73 = vector.broadcast %72 : f32 to vector<1x256xf32>
    %74 = arith.mulf %71, %73 : vector<1x256xf32>
    %75 = arith.addf %70, %74 : vector<1x256xf32>
    %76 = vector.extract_strided_slice %14 {offsets = [3, 0], sizes = [1, 256], strides = [1, 1]} : vector<8x256xf32> to vector<1x256xf32>
    %c1_30 = arith.constant 1 : index
    %c3_31 = arith.constant 3 : index
    %77 = memref.load %arg6[%c1_30, %c3_31] : memref<4x8xf32, #tpu.memory_space<smem>>
    %78 = vector.broadcast %77 : f32 to vector<1x256xf32>
    %79 = arith.mulf %76, %78 : vector<1x256xf32>
    %80 = arith.addf %75, %79 : vector<1x256xf32>
    %81 = vector.extract_strided_slice %14 {offsets = [4, 0], sizes = [1, 256], strides = [1, 1]} : vector<8x256xf32> to vector<1x256xf32>
    %c1_32 = arith.constant 1 : index
    %c4_33 = arith.constant 4 : index
    %82 = memref.load %arg6[%c1_32, %c4_33] : memref<4x8xf32, #tpu.memory_space<smem>>
    %83 = vector.broadcast %82 : f32 to vector<1x256xf32>
    %84 = arith.mulf %81, %83 : vector<1x256xf32>
    %85 = arith.addf %80, %84 : vector<1x256xf32>
    %86 = vector.extract_strided_slice %14 {offsets = [5, 0], sizes = [1, 256], strides = [1, 1]} : vector<8x256xf32> to vector<1x256xf32>
    %c1_34 = arith.constant 1 : index
    %c5_35 = arith.constant 5 : index
    %87 = memref.load %arg6[%c1_34, %c5_35] : memref<4x8xf32, #tpu.memory_space<smem>>
    %88 = vector.broadcast %87 : f32 to vector<1x256xf32>
    %89 = arith.mulf %86, %88 : vector<1x256xf32>
    %90 = arith.addf %85, %89 : vector<1x256xf32>
    %91 = vector.extract_strided_slice %14 {offsets = [6, 0], sizes = [1, 256], strides = [1, 1]} : vector<8x256xf32> to vector<1x256xf32>
    %c1_36 = arith.constant 1 : index
    %c6_37 = arith.constant 6 : index
    %92 = memref.load %arg6[%c1_36, %c6_37] : memref<4x8xf32, #tpu.memory_space<smem>>
    %93 = vector.broadcast %92 : f32 to vector<1x256xf32>
    %94 = arith.mulf %91, %93 : vector<1x256xf32>
    %95 = arith.addf %90, %94 : vector<1x256xf32>
    %96 = vector.extract_strided_slice %14 {offsets = [7, 0], sizes = [1, 256], strides = [1, 1]} : vector<8x256xf32> to vector<1x256xf32>
    %c1_38 = arith.constant 1 : index
    %c7_39 = arith.constant 7 : index
    %97 = memref.load %arg6[%c1_38, %c7_39] : memref<4x8xf32, #tpu.memory_space<smem>>
    %98 = vector.broadcast %97 : f32 to vector<1x256xf32>
    %99 = arith.mulf %96, %98 : vector<1x256xf32>
    %100 = arith.addf %95, %99 : vector<1x256xf32>
    %c1_40 = arith.constant 1 : index
    %101 = memref.load %arg7[%c1_40] : memref<4xf32, #tpu.memory_space<smem>>
    %102 = vector.broadcast %101 : f32 to vector<1x256xf32>
    %103 = arith.addf %100, %102 : vector<1x256xf32>
    %cst_41 = arith.constant 0.000000e+00 : f32
    %104 = vector.broadcast %cst_41 : f32 to vector<1x256xf32>
    %105 = arith.maximumf %103, %104 : vector<1x256xf32>
    %c1_42 = arith.constant 1 : index
    %106 = memref.load %arg8[%c1_42] : memref<4xf32, #tpu.memory_space<smem>>
    %107 = vector.broadcast %106 : f32 to vector<1x256xf32>
    %108 = arith.mulf %105, %107 : vector<1x256xf32>
    %109 = arith.addf %61, %108 : vector<1x256xf32>
    %110 = vector.extract_strided_slice %14 {offsets = [0, 0], sizes = [1, 256], strides = [1, 1]} : vector<8x256xf32> to vector<1x256xf32>
    %c2_43 = arith.constant 2 : index
    %c0_44 = arith.constant 0 : index
    %111 = memref.load %arg6[%c2_43, %c0_44] : memref<4x8xf32, #tpu.memory_space<smem>>
    %112 = vector.broadcast %111 : f32 to vector<1x256xf32>
    %113 = arith.mulf %110, %112 : vector<1x256xf32>
    %114 = vector.extract_strided_slice %14 {offsets = [1, 0], sizes = [1, 256], strides = [1, 1]} : vector<8x256xf32> to vector<1x256xf32>
    %c2_45 = arith.constant 2 : index
    %c1_46 = arith.constant 1 : index
    %115 = memref.load %arg6[%c2_45, %c1_46] : memref<4x8xf32, #tpu.memory_space<smem>>
    %116 = vector.broadcast %115 : f32 to vector<1x256xf32>
    %117 = arith.mulf %114, %116 : vector<1x256xf32>
    %118 = arith.addf %113, %117 : vector<1x256xf32>
    %119 = vector.extract_strided_slice %14 {offsets = [2, 0], sizes = [1, 256], strides = [1, 1]} : vector<8x256xf32> to vector<1x256xf32>
    %c2_47 = arith.constant 2 : index
    %c2_48 = arith.constant 2 : index
    %120 = memref.load %arg6[%c2_47, %c2_48] : memref<4x8xf32, #tpu.memory_space<smem>>
    %121 = vector.broadcast %120 : f32 to vector<1x256xf32>
    %122 = arith.mulf %119, %121 : vector<1x256xf32>
    %123 = arith.addf %118, %122 : vector<1x256xf32>
    %124 = vector.extract_strided_slice %14 {offsets = [3, 0], sizes = [1, 256], strides = [1, 1]} : vector<8x256xf32> to vector<1x256xf32>
    %c2_49 = arith.constant 2 : index
    %c3_50 = arith.constant 3 : index
    %125 = memref.load %arg6[%c2_49, %c3_50] : memref<4x8xf32, #tpu.memory_space<smem>>
    %126 = vector.broadcast %125 : f32 to vector<1x256xf32>
    %127 = arith.mulf %124, %126 : vector<1x256xf32>
    %128 = arith.addf %123, %127 : vector<1x256xf32>
    %129 = vector.extract_strided_slice %14 {offsets = [4, 0], sizes = [1, 256], strides = [1, 1]} : vector<8x256xf32> to vector<1x256xf32>
    %c2_51 = arith.constant 2 : index
    %c4_52 = arith.constant 4 : index
    %130 = memref.load %arg6[%c2_51, %c4_52] : memref<4x8xf32, #tpu.memory_space<smem>>
    %131 = vector.broadcast %130 : f32 to vector<1x256xf32>
    %132 = arith.mulf %129, %131 : vector<1x256xf32>
    %133 = arith.addf %128, %132 : vector<1x256xf32>
    %134 = vector.extract_strided_slice %14 {offsets = [5, 0], sizes = [1, 256], strides = [1, 1]} : vector<8x256xf32> to vector<1x256xf32>
    %c2_53 = arith.constant 2 : index
    %c5_54 = arith.constant 5 : index
    %135 = memref.load %arg6[%c2_53, %c5_54] : memref<4x8xf32, #tpu.memory_space<smem>>
    %136 = vector.broadcast %135 : f32 to vector<1x256xf32>
    %137 = arith.mulf %134, %136 : vector<1x256xf32>
    %138 = arith.addf %133, %137 : vector<1x256xf32>
    %139 = vector.extract_strided_slice %14 {offsets = [6, 0], sizes = [1, 256], strides = [1, 1]} : vector<8x256xf32> to vector<1x256xf32>
    %c2_55 = arith.constant 2 : index
    %c6_56 = arith.constant 6 : index
    %140 = memref.load %arg6[%c2_55, %c6_56] : memref<4x8xf32, #tpu.memory_space<smem>>
    %141 = vector.broadcast %140 : f32 to vector<1x256xf32>
    %142 = arith.mulf %139, %141 : vector<1x256xf32>
    %143 = arith.addf %138, %142 : vector<1x256xf32>
    %144 = vector.extract_strided_slice %14 {offsets = [7, 0], sizes = [1, 256], strides = [1, 1]} : vector<8x256xf32> to vector<1x256xf32>
    %c2_57 = arith.constant 2 : index
    %c7_58 = arith.constant 7 : index
    %145 = memref.load %arg6[%c2_57, %c7_58] : memref<4x8xf32, #tpu.memory_space<smem>>
    %146 = vector.broadcast %145 : f32 to vector<1x256xf32>
    %147 = arith.mulf %144, %146 : vector<1x256xf32>
    %148 = arith.addf %143, %147 : vector<1x256xf32>
    %c2_59 = arith.constant 2 : index
    %149 = memref.load %arg7[%c2_59] : memref<4xf32, #tpu.memory_space<smem>>
    %150 = vector.broadcast %149 : f32 to vector<1x256xf32>
    %151 = arith.addf %148, %150 : vector<1x256xf32>
    %cst_60 = arith.constant 0.000000e+00 : f32
    %152 = vector.broadcast %cst_60 : f32 to vector<1x256xf32>
    %153 = arith.maximumf %151, %152 : vector<1x256xf32>
    %c2_61 = arith.constant 2 : index
    %154 = memref.load %arg8[%c2_61] : memref<4xf32, #tpu.memory_space<smem>>
    %155 = vector.broadcast %154 : f32 to vector<1x256xf32>
    %156 = arith.mulf %153, %155 : vector<1x256xf32>
    %157 = arith.addf %109, %156 : vector<1x256xf32>
    %158 = vector.extract_strided_slice %14 {offsets = [0, 0], sizes = [1, 256], strides = [1, 1]} : vector<8x256xf32> to vector<1x256xf32>
    %c3_62 = arith.constant 3 : index
    %c0_63 = arith.constant 0 : index
    %159 = memref.load %arg6[%c3_62, %c0_63] : memref<4x8xf32, #tpu.memory_space<smem>>
    %160 = vector.broadcast %159 : f32 to vector<1x256xf32>
    %161 = arith.mulf %158, %160 : vector<1x256xf32>
    %162 = vector.extract_strided_slice %14 {offsets = [1, 0], sizes = [1, 256], strides = [1, 1]} : vector<8x256xf32> to vector<1x256xf32>
    %c3_64 = arith.constant 3 : index
    %c1_65 = arith.constant 1 : index
    %163 = memref.load %arg6[%c3_64, %c1_65] : memref<4x8xf32, #tpu.memory_space<smem>>
    %164 = vector.broadcast %163 : f32 to vector<1x256xf32>
    %165 = arith.mulf %162, %164 : vector<1x256xf32>
    %166 = arith.addf %161, %165 : vector<1x256xf32>
    %167 = vector.extract_strided_slice %14 {offsets = [2, 0], sizes = [1, 256], strides = [1, 1]} : vector<8x256xf32> to vector<1x256xf32>
    %c3_66 = arith.constant 3 : index
    %c2_67 = arith.constant 2 : index
    %168 = memref.load %arg6[%c3_66, %c2_67] : memref<4x8xf32, #tpu.memory_space<smem>>
    %169 = vector.broadcast %168 : f32 to vector<1x256xf32>
    %170 = arith.mulf %167, %169 : vector<1x256xf32>
    %171 = arith.addf %166, %170 : vector<1x256xf32>
    %172 = vector.extract_strided_slice %14 {offsets = [3, 0], sizes = [1, 256], strides = [1, 1]} : vector<8x256xf32> to vector<1x256xf32>
    %c3_68 = arith.constant 3 : index
    %c3_69 = arith.constant 3 : index
    %173 = memref.load %arg6[%c3_68, %c3_69] : memref<4x8xf32, #tpu.memory_space<smem>>
    %174 = vector.broadcast %173 : f32 to vector<1x256xf32>
    %175 = arith.mulf %172, %174 : vector<1x256xf32>
    %176 = arith.addf %171, %175 : vector<1x256xf32>
    %177 = vector.extract_strided_slice %14 {offsets = [4, 0], sizes = [1, 256], strides = [1, 1]} : vector<8x256xf32> to vector<1x256xf32>
    %c3_70 = arith.constant 3 : index
    %c4_71 = arith.constant 4 : index
    %178 = memref.load %arg6[%c3_70, %c4_71] : memref<4x8xf32, #tpu.memory_space<smem>>
    %179 = vector.broadcast %178 : f32 to vector<1x256xf32>
    %180 = arith.mulf %177, %179 : vector<1x256xf32>
    %181 = arith.addf %176, %180 : vector<1x256xf32>
    %182 = vector.extract_strided_slice %14 {offsets = [5, 0], sizes = [1, 256], strides = [1, 1]} : vector<8x256xf32> to vector<1x256xf32>
    %c3_72 = arith.constant 3 : index
    %c5_73 = arith.constant 5 : index
    %183 = memref.load %arg6[%c3_72, %c5_73] : memref<4x8xf32, #tpu.memory_space<smem>>
    %184 = vector.broadcast %183 : f32 to vector<1x256xf32>
    %185 = arith.mulf %182, %184 : vector<1x256xf32>
    %186 = arith.addf %181, %185 : vector<1x256xf32>
    %187 = vector.extract_strided_slice %14 {offsets = [6, 0], sizes = [1, 256], strides = [1, 1]} : vector<8x256xf32> to vector<1x256xf32>
    %c3_74 = arith.constant 3 : index
    %c6_75 = arith.constant 6 : index
    %188 = memref.load %arg6[%c3_74, %c6_75] : memref<4x8xf32, #tpu.memory_space<smem>>
    %189 = vector.broadcast %188 : f32 to vector<1x256xf32>
    %190 = arith.mulf %187, %189 : vector<1x256xf32>
    %191 = arith.addf %186, %190 : vector<1x256xf32>
    %192 = vector.extract_strided_slice %14 {offsets = [7, 0], sizes = [1, 256], strides = [1, 1]} : vector<8x256xf32> to vector<1x256xf32>
    %c3_76 = arith.constant 3 : index
    %c7_77 = arith.constant 7 : index
    %193 = memref.load %arg6[%c3_76, %c7_77] : memref<4x8xf32, #tpu.memory_space<smem>>
    %194 = vector.broadcast %193 : f32 to vector<1x256xf32>
    %195 = arith.mulf %192, %194 : vector<1x256xf32>
    %196 = arith.addf %191, %195 : vector<1x256xf32>
    %c3_78 = arith.constant 3 : index
    %197 = memref.load %arg7[%c3_78] : memref<4xf32, #tpu.memory_space<smem>>
    %198 = vector.broadcast %197 : f32 to vector<1x256xf32>
    %199 = arith.addf %196, %198 : vector<1x256xf32>
    %cst_79 = arith.constant 0.000000e+00 : f32
    %200 = vector.broadcast %cst_79 : f32 to vector<1x256xf32>
    %201 = arith.maximumf %199, %200 : vector<1x256xf32>
    %c3_80 = arith.constant 3 : index
    %202 = memref.load %arg8[%c3_80] : memref<4xf32, #tpu.memory_space<smem>>
    %203 = vector.broadcast %202 : f32 to vector<1x256xf32>
    %204 = arith.mulf %201, %203 : vector<1x256xf32>
    %205 = arith.addf %157, %204 : vector<1x256xf32>
    %c0_81 = arith.constant 0 : index
    %206 = memref.load %arg9[%c0_81] : memref<1xf32, #tpu.memory_space<smem>>
    %207 = vector.broadcast %206 : f32 to vector<1x256xf32>
    %208 = arith.addf %205, %207 : vector<1x256xf32>
    %c0_82 = arith.constant 0 : index
    %c0_83 = arith.constant 0 : index
    %209 = vector.load %arg10[%c0_82, %c0_83] : memref<1x256xf32, #tpu.memory_space<vmem>>, vector<1x256xf32>
    tpu.vector_store %arg10[%c0_82, %c0_83], %208 {strides = array<i32>} : memref<1x256xf32, #tpu.memory_space<vmem>>, vector<1x256xf32>,
    return
  }
  func.func @transform_0(%arg0: i32) -> (i32, i32) {
    %c0_i32 = arith.constant 0 : i32
    %c0_i32_0 = arith.constant 0 : i32
    return %arg0, %c0_i32 : i32, i32
  }
  func.func @transform_1(%arg0: i32) -> (i32, i32) {
    %c0_i32 = arith.constant 0 : i32
    %c0_i32_0 = arith.constant 0 : i32
    %c0_i32_1 = arith.constant 0 : i32
    return %c0_i32, %c0_i32_0 : i32, i32
  }
  func.func @transform_2(%arg0: i32) -> (i32, i32) {
    %c0_i32 = arith.constant 0 : i32
    %c0_i32_0 = arith.constant 0 : i32
    %c0_i32_1 = arith.constant 0 : i32
    return %c0_i32, %c0_i32_0 : i32, i32
  }
  func.func @transform_3(%arg0: i32) -> (i32, i32) {
    %c0_i32 = arith.constant 0 : i32
    %c0_i32_0 = arith.constant 0 : i32
    %c0_i32_1 = arith.constant 0 : i32
    return %c0_i32, %c0_i32_0 : i32, i32
  }
  func.func @transform_4(%arg0: i32) -> (i32, i32) {
    %c0_i32 = arith.constant 0 : i32
    %c0_i32_0 = arith.constant 0 : i32
    %c0_i32_1 = arith.constant 0 : i32
    return %c0_i32, %c0_i32_0 : i32, i32
  }
  func.func @transform_5(%arg0: i32) -> (i32, i32) {
    %c0_i32 = arith.constant 0 : i32
    %c0_i32_0 = arith.constant 0 : i32
    %c0_i32_1 = arith.constant 0 : i32
    return %c0_i32, %c0_i32_0 : i32, i32
  }
  func.func @transform_6(%arg0: i32) -> i32 {
    %c0_i32 = arith.constant 0 : i32
    %c0_i32_0 = arith.constant 0 : i32
    return %c0_i32 : i32
  }
  func.func @transform_7(%arg0: i32) -> i32 {
    %c0_i32 = arith.constant 0 : i32
    %c0_i32_0 = arith.constant 0 : i32
    return %c0_i32 : i32
  }
  func.func @transform_8(%arg0: i32) -> i32 {
    %c0_i32 = arith.constant 0 : i32
    %c0_i32_0 = arith.constant 0 : i32
    return %c0_i32 : i32
  }
  func.func @transform_9(%arg0: i32) -> (i32, i32) {
    %c0_i32 = arith.constant 0 : i32
    %c0_i32_0 = arith.constant 0 : i32
    return %c0_i32, %arg0 : i32, i32
  }
}

</mosaic_0001>

<bundles_post_ra>
// kernel: tpu_custom_call.1
= control target key start
LH: loop header
LB: loop body
LE: loop exit
PB: predicated region body
PF: predicated region fallthrough
CT: control target
= control target key end

     0   :  { %s2220_s0 = inlined_call_operand.vmem [shape: f32[512,32], index: 0, kind: input, shape index: {}]   ;;  %s2221_s1 = inlined_call_operand.vmem [shape: f32[16,32], index: 1, kind: input, shape index: {}]   ;;  %s2222_s2 = inlined_call_operand.vmem [shape: f32[16,1], index: 2, kind: input, shape index: {}]   ;;  %s2223_s3 = inlined_call_operand.vmem [shape: f32[8,16], index: 3, kind: input, shape index: {}]   ;;  %s2224_s4 = inlined_call_operand.vmem [shape: f32[8,1], index: 4, kind: input, shape index: {}]   ;;  %s2225_s5 = inlined_call_operand.vmem [shape: f32[4,8], index: 5, kind: input, shape index: {}]   ;;  %s2226_s6 = inlined_call_operand.vmem [shape: f32[4], index: 6, kind: input, shape index: {}]   ;;  %s2227_s7 = inlined_call_operand.vmem [shape: f32[4], index: 7, kind: input, shape index: {}]   ;;  %s2228_s8 = inlined_call_operand.<no memory space> [shape: f32[1], index: 8, kind: input, shape index: {}]   ;;  %s2229_s9 = inlined_call_operand.hbm [shape: f32[1,512], index: 9, kind: output, shape index: {}]  }
   0x1   :  { %2240 = sst [smem:[#allocation19_spill]] %s2220_s0 }
   0x2   :  { %2241 = sst [smem:[#allocation20_spill]] %s2221_s1 }
   0x3   :  { %2242 = sst [smem:[#allocation21_spill]] %s2222_s2 }
   0x4   :  { %2243 = sst [smem:[#allocation22_spill]] %s2223_s3 }
   0x5   :  { %2244 = sst [smem:[#allocation23_spill]] %s2224_s4 }
   0x6   :  { %2245 = sst [smem:[#allocation24_spill]] %s2225_s5 }
   0x7   :  { %2246 = sst [smem:[#allocation25_spill]] %s2226_s6 }
   0x8   :  { %2247 = sst [smem:[#allocation26_spill]] %s2227_s7 }
   0x9   :  { %2248 = sst [smem:[#allocation27_spill]] %s2229_s9 }
   0xa   :  { %14 = sst [smem:[#allocation2]] %s2228_s8 }
   0xb   :  { %15 = vsyncpa [#allocation5], 0 }
   0xc   :  { %16 = vsyncpa [#allocation7], 0 }
   0xd   :  { %17 = vsyncpa [#allocation4], 0 }
   0xe   :  { %19 = vsyncpa [#allocation4 + $0x1], 0  ;;  %s1649_s11 = smov 0   ;;  %s1651_s12 = smov 0  }
   0xf   :  { %s1653_s13 = smov 0   ;;  %s1655_s14 = smov 0  }
  0x10 LB: > { %2249 = sst [smem:[#allocation13_spill]] %s1575_s11  ;;  %s1670_s8 = sadd.s32 4294967295, %s1587_s14   ;;  %s1587_s14 = sphi %s1655_s14, %s2281_s14   ;;  %s1583_s13 = sphi %s1653_s13, %s2283_s13   ;;  %s1579_s12 = sphi %s1651_s12, %s2285_s12   ;;  %s1575_s11 = sphi %s1649_s11, %s2284_s11  }
  0x11   : > { %2250 = sst [smem:[#allocation14_spill]] %s1583_s13  ;;  %s1218_s15 = sadd.s32 4294967294, %s1587_s14  }
  0x12   : > { %2251 = sst [smem:[#allocation15_spill]] %s1587_s14  ;;  %s1674_s16 = sadd.s32 1, %s1587_s14  }
  0x13   : > { %2252 = sst [smem:[#allocation16_spill]] %s1674_s16  ;;  %s226_s17 = sadd.s32 1, %s1583_s13 }
  0x14   : > { %s223_s18 = ssub.s32 %s1587_s14, %s1674_s16  ;;  %p236_p0 = scmp.ne.s32.totalorder %s1583_s13, %s1579_s12 }
  0x15   : > { %p224_p1 = scmp.eq.s32.totalorder %s223_s18, 0  ;;  %p237_p2 = scmp.eq.s32.totalorder %s1670_s8, 1 }
  0x16   : > { %p242_p3 = scmp.ne.s32.totalorder %s1579_s12, %s1575_s11  ;;  %p243_p4 = scmp.eq.s32.totalorder %s1218_s15, 1 }
  0x17   : > { %s1685_s19 = scalar_select %p224_p1, %s1583_s13, %s226_s17  }
  0x18   : > { %p1687_p5 = por %p237_p2, %p236_p0  ;;  %p1691_p6 = por %p243_p4, %p242_p3 }
  0x19   : > { %2253 = sst [smem:[#allocation17_spill]] %s1685_s19  ;;  %p1219_p7 = scmp.ge.s32.totalorder %s1587_s14, 1 }
  0x1a   : > { %s2254_s20 = scalar_select %p1687_p5, 1, 0 }
  0x1b   : > { %s2255_s21 = scalar_select %p1691_p6, 1, 0 }
  0x1c   : > { %p250_p8 = scmp.lt.s32.totalorder %s1587_s14, 3  ;;  %p2230_p9 = scmp.eq.s32.totalorder %s1670_s8, 0 }
  0x1d   : > { %2256 = sst [smem:[#allocation18_spill]] %s2255_s21  ;;  %s2259_s5 = sld [smem:[#allocation24_spill]] }
  0x1e   : > { %p1698_p10 = pnand %p1219_p7, %p250_p8  ;;  %s2258_s6 = sld [smem:[#allocation25_spill]] }
  0x1f   : > { %s2261_s7 = sld [smem:[#allocation26_spill]] }
  0x20   : > { %s2257_s22 = scalar_select %p1698_p10, 1, 0 }
  0x21   : > { %p1411_p11 = pneg %p1698_p10 }
  0x23   : > { %s275_s28 = sshll.u32 %s2259_s5, 4  ;;  %p1712_p12 = pnand %p2230_p9, %p1411_p11  ;;  %s276_s28 = int_to_ptr.vmem [resolvable:$true] %s275_s28 }
  0x24   : > { %s286_s25 = sshll.u32 %s2258_s6, 4  ;;  %s287_s25 = int_to_ptr.vmem [resolvable:$true] %s286_s25 }
  0x25   : > { %s297_s15 = sshll.u32 %s2261_s7, 4  ;;  %s1472_s17 = scalar_lea.vmem %s287_s25, 16  ;;  %s1719_s15 = int_to_ptr.vmem [resolvable:$true] %s297_s15 }
  0x26   : > { %p1473_p13 = scmp.ne.s32.totalorder %s287_s25, %s1472_s17  ;;  %p1474_p0 = pneg %p1712_p12 }
  0x27   : > { %p1480_p3 = scmp.lt.s32.totalorder %s287_s25, %s287_s25  ;;  %p1481_p4 = scmp.lt.s32.totalorder %s1472_s17, %s1472_s17 }
  0x28   : > { %p1475_p1 = pnand %p1474_p0, %p1473_p13 }
  0x29   : > { %p1482_p7 = por %p1481_p4, %p1480_p3 }
  0x2a   : > { %p1476_p2 = pneg %p1475_p1 }
  0x2c   : > { %p1483_p8 = pnand %p1482_p7, %p1476_p2 }
  0x2e   : > { %1486 = shalt.err (!%p1483_p8)
}
  0x2f   : > { %s1589_s18 = smov [#allocation6]   ;;  %s1487_s23 = scalar_lea.vmem %s276_s28, 64 }
  0x30   : > { %1417 = dma.vmem_to_smem (!%p1712_p12), %s287_s25, 16, %s1589_s18, [#allocation7]  }
  0x31   : > { %p1488_p11 = scmp.ne.s32.totalorder %s276_s28, %s1487_s23  ;;  %p1495_p5 = scmp.lt.s32.totalorder %s276_s28, %s276_s28 }
  0x32   : > { %p1496_p10 = scmp.lt.s32.totalorder %s1487_s23, %s1487_s23 }
  0x33   : > { %p1490_p9 = pnand %p1488_p11, %p1474_p0 }
  0x34   : > { %p1497_p13 = por %p1496_p10, %p1495_p5 }
  0x35   : > { %p1491_p6 = pneg %p1490_p9 }
  0x37   : > { %p1498_p1 = pnand %p1497_p13, %p1491_p6 }
  0x39   : > { %1501 = shalt.err (!%p1498_p1)
}
  0x3a   : > { %s1590_s24 = smov [#allocation3]   ;;  %s1502_s25 = scalar_lea.vmem %s1719_s15, 16 }
  0x3b   : > { %1414 = dma.vmem_to_smem (!%p1712_p12), %s276_s28, 64, %s1590_s24, [#allocation5]  }
  0x3c   : > { %p1503_p2 = scmp.ne.s32.totalorder %s1719_s15, %s1502_s25  ;;  %p1510_p9 = scmp.lt.s32.totalorder %s1719_s15, %s1719_s15 }
  0x3d   : > { %p1511_p7 = scmp.lt.s32.totalorder %s1502_s25, %s1502_s25 }
  0x3e   : > { %p1505_p3 = pnand %p1503_p2, %p1474_p0 }
  0x3f   : > { %p1512_p5 = por %p1511_p7, %p1510_p9 }
  0x40   : > { %p1506_p4 = pneg %p1505_p3 }
  0x42   : > { %p1513_p6 = pnand %p1512_p5, %p1506_p4 }
  0x44   : > { %1516 = shalt.err (!%p1513_p6)
}
  0x45   : > { %s1591_s26 = smov [#allocation8]   ;;  %p2262_p10 = scmp.ne.s32.totalorder %s2257_s22, 0 }
  0x46   : > { %1420 = dma.vmem_to_smem (!%p1712_p12), %s1719_s15, 16, %s1591_s26, [#allocation7]  }
  0x47   : > { %322 = sbr.rel (%p2262_p10) target bundleno = 687 (0x2af), region = 56  ;;  %p2263_p8 = scmp.eq.s32.totalorder (!%p2262_p10), %s1670_s8, 0 }
  0x4e   : > { %1562 = dma.done.wait (%p2263_p8), [#allocation5], 64   ;;  %p2264_p0 = pmov %p2263_p8 }
  0x50   : > { %1564 = vsyncadd (%p2264_p0), [#allocation5], 4294967232  ;;  %p2265_p11 = pmov %p2264_p0 }
  0x51   : > { %p2266_p13 = pmov %p2264_p0 }
  0x52   : > { %1566 = dma.done.wait (%p2265_p11), [#allocation7], 32  }
  0x53   : > { %1568 = vsyncadd (%p2266_p13), [#allocation7], 4294967264 }
  0x54   : > { %336 = sfence }
  0x55   : > { %s1754_s27 = sshll.u32 %s1670_s8, 5  ;;  %vm420_vm0 = vcmask 261120   ;;  %s2267_s1 = sld [smem:[#allocation20_spill]]  ;;  %v1592_v2 = vmov 0   ;;  %v1593_v54 = vmov 0.0   ;;  %vm611_vm2 = vcmask 130048  }
  0x56   : > { %s2268_s2 = sld [smem:[#allocation21_spill]]  ;;  %p368_p12 = scmp.lt.s32.totalorder %s1754_s27, 63  ;;  %1470 = vset.pattern.permute.xlu0 %v1592_v2  ;;  %1471 = vset.pattern.permute.xlu1 %v1592_v2  ;;  %vm1778_vm1 = vmpackc.low %vm420_vm0, %vm420_vm0 }
  0x57   : > { %s2269_s0 = sld [smem:[#allocation19_spill]]  ;;  %679 = vmatprep.mubr.f32.mxu1 %v1593_v54  ;;  %s2272_s4 = sld [smem:[#allocation23_spill]] }
  0x58   : > { %s369_s8 = scalar_select %p368_p12, %s1754_s27, 63 }
  0x59   : > { %s2273_s3 = sld [smem:[#allocation22_spill]]  ;;  %s1861_s10 = sld [smem:[#allocation3 + $0x1]] }
  0x5a   : > { %s1230_s17 = sshll.u32 %s369_s8, 3  ;;  %s1859_s8 = sld [smem:[#allocation3]] }
  0x5b   : > { %v1759_v0 = vld [vmem:[%s2267_s1] sm:$0xff]  ;;  %v407_v53 = vld [vmem:[%s2267_s1 + $0x8] sm:$0xff]  ;;  %s1863_s15 = sld [smem:[#allocation3 + $0x2]]  ;;  %s1867_s18 = sld [smem:[#allocation3 + $0x4]] }
  0x5c   : > { %v408_v1 = vld [vmem:[%s2268_s2] sm:$0xff]  ;;  %1341 = vmatprep.mubr.msk.f32.mxu0 %vm420_vm0, %v1759_v0  ;;  %v409_v3 = vld [vmem:[%s2268_s2 + $0x8] sm:$0xff]  ;;  %s1869_s23 = sld [smem:[#allocation3 + $0x5]]  ;;  %s1873_s25 = sld [smem:[#allocation3 + $0x7]] }
  0x5d   : > { %412 = vperm.xlu0 %1470, %v408_v1   ;;  %s1774_s24 = scalar_lea.vmem %s2269_s0, %s1230_s17  ;;  %v605_v55 = vld [vmem:[%s2272_s4] sm:$0xff]  ;;  %s1865_s17 = sld [smem:[#allocation3 + $0x3]] }
  0x5e   : > { %v390_v5 = vld [vmem:[%s1774_s24 + $0x80] sm:$0xff]  ;;  %v391_v6 = vld [vmem:[%s1774_s24 + $0x88] sm:$0xff]  ;;  %v392_v10 = vld [vmem:[%s1774_s24 + $0x90] sm:$0xff]  ;;  %608 = vperm.xlu1 %1471, %v605_v55   ;;  %s1875_s26 = sld [smem:[#allocation3 + $0x80]]  ;;  %s1877_s22 = sld [smem:[#allocation3 + $0x81]] }
  0x5f   : > { %v374_v7 = vld [vmem:[%s1774_s24] sm:$0xff]  ;;  %v1345_v8 = vpack.c.bf16 %v391_v6, %v390_v5  ;;  %v375_v9 = vld [vmem:[%s1774_s24 + $0x8] sm:$0xff]  ;;  %v393_v11 = vld [vmem:[%s1774_s24 + $0x98] sm:$0xff]  ;;  %s1879_s28 = sld [smem:[#allocation3 + $0x82]]  ;;  %s1881_s29 = sld [smem:[#allocation3 + $0x83]] }
  0x60   : > { %v1348_v12 = vpack.c.bf16 %v375_v9, %v374_v7  ;;  %v1351_v13 = vpack.c.bf16 %v393_v11, %v392_v10  ;;  %v376_v14 = vld [vmem:[%s1774_s24 + $0x10] sm:$0xff]  ;;  %v377_v15 = vld [vmem:[%s1774_s24 + $0x18] sm:$0xff]  ;;  %v394_v16 = vld [vmem:[%s1774_s24 + $0xa0] sm:$0xff]  ;;  %s1883_s30 = sld [smem:[#allocation3 + $0x84]]  ;;  %s1885_s0 = sld [smem:[#allocation3 + $0x85]]  ;;  %v689_v9 = vstv %s1859_s8 }
  0x61   : > { %417 = vperm.xlu0 %1470, %v409_v3   ;;  %1347 = vmatprep.subr.msk.bf16.mxu0 %vm1778_vm1, %v1345_v8  ;;  %v395_v17 = vld [vmem:[%s1774_s24 + $0xa8] sm:$0xff]  ;;  %v1354_v18 = vpack.c.bf16 %v377_v15, %v376_v14  ;;  %v378_v20 = vld [vmem:[%s1774_s24 + $0x20] sm:$0xff]  ;;  %v396_v22 = vld [vmem:[%s1774_s24 + $0xb0] sm:$0xff]  ;;  %s1887_s1 = sld [smem:[#allocation3 + $0x86]]  ;;  %s1889_s2 = sld [smem:[#allocation3 + $0x87]]  ;;  %v693_v11 = vstv %s1861_s10 }
  0x62   : > { %1350 = vmatpush3.bf16.xpose.msk.msra.mxu0 %vm1778_vm1, %v1348_v12  ;;  %v1357_v19 = vpack.c.bf16 %v395_v17, %v394_v16  ;;  %v379_v21 = vld [vmem:[%s1774_s24 + $0x28] sm:$0xff]  ;;  %v397_v23 = vld [vmem:[%s1774_s24 + $0xb8] sm:$0xff]  ;;  %v380_v26 = vld [vmem:[%s1774_s24 + $0x30] sm:$0xff]  ;;  %s1893_s4 = sld [smem:[#allocation3 + $0x101]]  ;;  %s1895_s5 = sld [smem:[#allocation3 + $0x102]]  ;;  %v705_v12 = vstv %s1863_s15 }
  0x63   : > { %1353 = vmatprep.subr.msk.bf16.mxu0 %vm1778_vm1, %v1351_v13  ;;  %v1360_v24 = vpack.c.bf16 %v379_v21, %v378_v20  ;;  %v1363_v25 = vpack.c.bf16 %v397_v23, %v396_v22  ;;  %v381_v27 = vld [vmem:[%s1774_s24 + $0x38] sm:$0xff]  ;;  %v398_v28 = vld [vmem:[%s1774_s24 + $0xc0] sm:$0xff]  ;;  %v399_v29 = vld [vmem:[%s1774_s24 + $0xc8] sm:$0xff]  ;;  %s1897_s6 = sld [smem:[#allocation6]]  ;;  %s1899_s7 = sld [smem:[#allocation3 + $0x103]]  ;;  %v717_v13 = vstv %s1865_s17 }
  0x64   : > { %v1366_v30 = vpack.c.bf16 %v381_v27, %v380_v26  ;;  %v1369_v31 = vpack.c.bf16 %v399_v29, %v398_v28  ;;  %v382_v32 = vld [vmem:[%s1774_s24 + $0x40] sm:$0xff]  ;;  %v383_v33 = vld [vmem:[%s1774_s24 + $0x48] sm:$0xff]  ;;  %v400_v34 = vld [vmem:[%s1774_s24 + $0xd0] sm:$0xff]  ;;  %s1901_s19 = sld [smem:[#allocation8]]  ;;  %s1903_s13 = sld [smem:[#allocation3 + $0x104]]  ;;  %v729_v14 = vstv %s1867_s18 }
  0x65   : > { %v401_v35 = vld [vmem:[%s1774_s24 + $0xd8] sm:$0xff]  ;;  %v1372_v36 = vpack.c.bf16 %v383_v33, %v382_v32  ;;  %v384_v38 = vld [vmem:[%s1774_s24 + $0x50] sm:$0xff]  ;;  %v402_v40 = vld [vmem:[%s1774_s24 + $0xe0] sm:$0xff]  ;;  %s1905_s16 = sld [smem:[#allocation3 + $0x105]]  ;;  %s1907_s21 = sld [smem:[#allocation3 + $0x106]]  ;;  %v741_v15 = vstv %s1869_s23 }
  0x66   : > { %v1375_v37 = vpack.c.bf16 %v401_v35, %v400_v34  ;;  %v385_v39 = vld [vmem:[%s1774_s24 + $0x58] sm:$0xff]  ;;  %v403_v41 = vld [vmem:[%s1774_s24 + $0xe8] sm:$0xff]  ;;  %v386_v44 = vld [vmem:[%s1774_s24 + $0x60] sm:$0xff]  ;;  %s1910_s11 = sld [smem:[#allocation6 + $0x1]]  ;;  %s1912_s14 = sld [smem:[#allocation3 + $0x107]]  ;;  %v765_v17 = vstv %s1873_s25 }
  0x67   : > { %v1378_v42 = vpack.c.bf16 %v385_v39, %v384_v38  ;;  %v1381_v43 = vpack.c.bf16 %v403_v41, %v402_v40  ;;  %v387_v45 = vld [vmem:[%s1774_s24 + $0x68] sm:$0xff]  ;;  %v404_v46 = vld [vmem:[%s1774_s24 + $0xf0] sm:$0xff]  ;;  %v405_v47 = vld [vmem:[%s1774_s24 + $0xf8] sm:$0xff]  ;;  %s1918_s9 = sld [smem:[#allocation3 + $0x180]]  ;;  %v791_v20 = vstv %s1877_s22  ;;  %s1928_s8 = sld [smem:[#allocation3 + $0x181]] }
  0x68   : > { %v1384_v48 = vpack.c.bf16 %v387_v45, %v386_v44  ;;  %v1387_v49 = vpack.c.bf16 %v405_v47, %v404_v46  ;;  %v388_v50 = vld [vmem:[%s1774_s24 + $0x70] sm:$0xff]  ;;  %v389_v51 = vld [vmem:[%s1774_s24 + $0x78] sm:$0xff]  ;;  %v604_v8 = vld [vmem:[%s2273_s3] sm:$0xff]  ;;  %s1871_s24 = sld [smem:[#allocation3 + $0x6]]  ;;  %s1891_s3 = sld [smem:[#allocation3 + $0x100]]  ;;  %v803_v21 = vstv %s1879_s28 }
  0x69   : > { %v1390_v52 = vpack.c.bf16 %v389_v51, %v388_v50  ;;  %v815_v22 = vstv %s1881_s29  ;;  %v827_v23 = vstv %s1883_s30  ;;  %v839_v26 = vstv %s1885_s0  ;;  %s1933_s10 = sld [smem:[#allocation8 + $0x1]]  ;;  %s1938_s15 = sld [smem:[#allocation3 + $0x182]] }
  0x6a   : > { %1356 = vmatpush3.bf16.xpose.msk.msra.mxu0 %vm1778_vm1, %v1354_v18  ;;  %v787_v18 = vstv %s1875_s26  ;;  %v851_v27 = vstv %s1887_s1  ;;  %v863_v28 = vstv %s1889_s2  ;;  %v903_v32 = vstv %s1895_s5  ;;  %s1982_s17 = sld [smem:[#allocation3 + $0x183]]  ;;  %s1993_s18 = sld [smem:[#allocation3 + $0x184]] }
  0x6b   : > { %1359 = vmatprep.subr.msk.bf16.mxu0 %vm1778_vm1, %v1357_v19  ;;  %v777_v34 = vstv %s1897_s6  ;;  %v915_v35 = vstv %s1899_s7  ;;  %v783_v38 = vstv %s1901_s19  ;;  %v939_v39 = vstv %s1905_s16  ;;  %s1995_s23 = sld [smem:[#allocation3 + $0x185]]  ;;  %s2005_s26 = sld [smem:[#allocation6 + $0x2]] }
  0x6c   : > { %v951_v40 = vstv %s1907_s21  ;;  %v963_v44 = vstv %s1912_s14  ;;  %s2007_s22 = sld [smem:[#allocation3 + $0x187]]  ;;  %s2140_s0 = sld [smem:[#allocation8 + $0x2]] }
  0x6d   : > { %s2144_s1 = sld [smem:[#allocation6 + $0x3]]  ;;  %p2276_p2 = scmp.ne.s32.totalorder %s2254_s20, 0 }
  0x6e   : > { %v753_v16 = vstv %s1871_s24  ;;  %s2000_s24 = sld [smem:[#allocation3 + $0x186]]  ;;  %s2168_s2 = sld [smem:[#allocation8 + $0x3]] }
  0x6f   : > { %s1595_s25 = smov [#allocation9]  }
  0x70   : > { %s1521_s28 = sshll.u32 %s1595_s25, 4  ;;  %s1522_s28 = int_to_ptr.vmem [resolvable:$false] %s1521_s28 }
  0x71   : > { %s1523_s29 = scalar_lea.vmem %s1522_s28, 64 }
  0x72   : > { %1362 = vmatpush3.bf16.xpose.msk.msra.mxu0 %vm1778_vm1, %v1360_v24 }
  0x73   : > { %1365 = vmatprep.subr.msk.bf16.mxu0 %vm1778_vm1, %v1363_v25 }
  0x7a   : > { %1368 = vmatpush3.bf16.xpose.msk.msra.mxu0 %vm1778_vm1, %v1366_v30  ;;  %v887_v30 = vstv %s1891_s3  ;;  %s1086_s3 = sld [smem:[#allocation2]] }
  0x7b   : > { %1371 = vmatprep.subr.msk.bf16.mxu0 %vm1778_vm1, %v1369_v31  ;;  %v891_v31 = vstv %s1893_s4  ;;  %s364_s4 = sand.u32 1, %s1579_s12  }
  0x7c   : > { %s1228_s5 = sshll.u32 %s364_s4, 1  ;;  %s1114_s19 = scalar_lea.sflag [#allocation4], %s364_s4 }
  0x7d   : > { %s366_s6 = scalar_lea.vmem [#allocation9], %s1228_s5 }
  0x7e   : > { %s1128_s7 = sshll.u32 %s366_s6, 4  ;;  %s2180_s7 = int_to_ptr.vmem [resolvable:$true] %s1128_s7 }
  0x7f   : > { %s1517_s21 = scalar_lea.vmem %s2180_s7, 32  ;;  %p1524_p9 = scmp.lt.s32.totalorder %s2180_s7, %s1522_s28 }
  0x80   : > { %p1518_p1 = scmp.ne.s32.totalorder %s2180_s7, %s1517_s21  ;;  %p1525_p7 = scmp.lt.s32.totalorder %s1523_s29, %s1517_s21 }
  0x82   : > { %1374 = vmatpush3.bf16.xpose.msk.msra.mxu0 %vm1778_vm1, %v1372_v36  ;;  %v927_v36 = vstv %s1903_s13  ;;  %s2274_s13 = sld [smem:[#allocation27_spill]]  ;;  %p1519_p3 = pnand %p1518_p1, %p2276_p2 }
  0x83   : > { %1377 = vmatprep.subr.msk.bf16.mxu0 %vm1778_vm1, %v1375_v37  ;;  %p1526_p5 = por %p1525_p7, %p1524_p9 }
  0x84   : > { %p1520_p4 = pneg %p1519_p3 }
  0x86   : > { %p1527_p6 = pnand %p1526_p5, %p1520_p4 }
  0x88   : > { %s2275_s16 = smov %s2274_s13  ;;  %s2178_s14 = scalar_lea.hbm %s2274_s13, %s1754_s27 }
  0x8a   : > { %1380 = vmatpush3.bf16.xpose.msk.msra.mxu0 %vm1778_vm1, %v1378_v42 }
  0x8b   : > { %1383 = vmatprep.subr.msk.bf16.mxu0 %vm1778_vm1, %v1381_v43  ;;  %v875_v43 = vstv %s1910_s11 }
  0x92   : > { %1386 = vmatpush3.bf16.xpose.msk.msra.mxu0 %vm1778_vm1, %v1384_v48  ;;  %v987_v48 = vstv %s1918_s9 }
  0x93   : > { %1389 = vmatprep.subr.msk.bf16.mxu0 %vm1778_vm1, %v1387_v49 }
  0x9a   : > { %1392 = vmatpush3.bf16.xpose.msk.msra.mxu0 %vm1778_vm1, %v1390_v52 }
  0xa1   : > { %1342 = vmatmul.mubr.msk.f32.vlgmr.msra.gmra.mrb[0].mxu0 %vm420_vm0, %v1759_v0 }
  0xa2   : > { %1343 = vmatprep.mubr.msk.f32.mxu0 %vm420_vm0, %v407_v53 }
  0xa5   : > { %1344 = vmatmul.mubr.msk.f32.gmra.mrb[2].mxu0 %vm420_vm0, %v407_v53 }
  0xdc   : > { %v413_v56 = vpop.permute.xlu0 %412 }
  0xdd   : > { %v609_v10 = vpop.permute.xlu1 %608 }
  0xe0   : > { %v418_v60 = vpop.permute.xlu0 %417 }
 0x174   : > { %v589_v57 = vpop.f32.mrb[0].mxu0 }
 0x175   : > { %v591_v58 = vpop.f32.mrb[1].mxu0  ;;  %v590_v59 = vadd.f32 %v589_v57, %v413_v56 }
 0x176   : > { %v592_v61 = vadd.f32 %v591_v58, %v413_v56  ;;  %v991_v56 = vstv %s1928_s8 }
 0x177   : > { %v600_v2 = vmax.f32 %v590_v59, 0.0 }
 0x178   : > { %v595_v62 = vpop.f32.mrb[2].mxu0  ;;  %v601_v4 = vmax.f32 %v592_v61, 0.0 }
 0x179   : > { %v596_v63 = vadd.f32 %v595_v62, %v418_v60  ;;  %v597_v0 = vpop.f32.mrb[3].mxu0 }
 0x17a   : > { %v598_v1 = vadd.f32 %v597_v0, %v418_v60  ;;  %v1003_v0 = vstv %s1938_s15 }
 0x17b   : > { %v602_v3 = vmax.f32 %v596_v63, 0.0  ;;  %v881_v63 = vstv %s1933_s10 }
 0x17c   : > { %v603_v5 = vmax.f32 %v598_v1, 0.0 }
 0x17d   : > { %v1395_v6 = vpack.c.bf16 %v602_v3, %v600_v2 }
 0x17e   : > { %v1393_v7 = vpack.c.bf16 %v603_v5, %v601_v4 }
 0x180   : > { %1394 = vmatprep.subr.bf16.mxu1 %v1393_v7 }
 0x181   : > { %1396 = vmatpush1.bf16.msra.mxu1 %v1395_v6 }
 0x184   : > { %1265 = vmatmul.mubr.msk.f32.vlgmr.msra.gmra.mrb[0].mxu1 %vm611_vm2, %v604_v8 }
 0x257   : > { %v681_v19 = vpop.f32.mrb[0].mxu1 }
 0x258   : > { %v682_v24 = vadd.f32 %v681_v19, %v609_v10  ;;  %v683_v25 = vpop.f32.mrb[1].mxu1 }
 0x259   : > { %v684_v29 = vadd.f32 %v683_v25, %v609_v10 }
 0x25a   : > { %v1940_v33 = vmax.f32 %v682_v24, 0.0 }
 0x25b   : > { %v1945_v37 = vmax.f32 %v684_v29, 0.0 }
 0x25c   : > { %v694_v41 = vmul.f32 %v693_v11, %v1940_v33  ;;  %v706_v42 = vmul.f32 %v705_v12, %v1940_v33  ;;  %v690_v45 = vmul.f32 %v689_v9, %v1940_v33  ;;  %v718_v50 = vmul.f32 %v717_v13, %v1940_v33 }
 0x25d   : > { %v695_v46 = vmul.f32 %v693_v11, %v1945_v37  ;;  %v707_v47 = vmul.f32 %v705_v12, %v1945_v37  ;;  %v719_v51 = vmul.f32 %v717_v13, %v1945_v37  ;;  %v730_v52 = vmul.f32 %v729_v14, %v1940_v33 }
 0x25e   : > { %v698_v49 = vrot.slane %v694_v41, 1  ;;  %v691_v53 = vmul.f32 %v689_v9, %v1945_v37  ;;  %v731_v55 = vmul.f32 %v729_v14, %v1945_v37  ;;  %v710_v58 = vrot.slane %v706_v42, 2 }
 0x25f   : > { %v699_v54 = vrot.slane %v695_v46, 1  ;;  %v742_v59 = vmul.f32 %v741_v15, %v1940_v33  ;;  %v743_v60 = vmul.f32 %v741_v15, %v1945_v37  ;;  %v711_v62 = vrot.slane %v707_v47, 2 }
 0x260   : > { %v702_v57 = vadd.f32 %v698_v49, %v690_v45  ;;  %v722_v2 = vrot.slane %v718_v50, 3  ;;  %v723_v3 = vrot.slane %v719_v51, 3  ;;  %v734_v4 = vrot.slane %v730_v52, 4 }
 0x261   : > { %v703_v61 = vadd.f32 %v699_v54, %v691_v53  ;;  %v735_v6 = vrot.slane %v731_v55, 4  ;;  %v754_v7 = vmul.f32 %v753_v16, %v1940_v33  ;;  %v755_v8 = vmul.f32 %v753_v16, %v1945_v37 }
 0x262   : > { %v714_v1 = vadd.f32 %v710_v58, %v702_v57  ;;  %v746_v10 = vrot.slane %v742_v59, 5  ;;  %v747_v11 = vrot.slane %v743_v60, 5  ;;  %v766_v12 = vmul.f32 %v765_v17, %v1940_v33 }
 0x263   : > { %v715_v5 = vadd.f32 %v711_v62, %v703_v61  ;;  %v788_v14 = vmul.f32 %v787_v18, %v1940_v33  ;;  %v792_v15 = vmul.f32 %v791_v20, %v1940_v33  ;;  %v793_v19 = vmul.f32 %v791_v20, %v1945_v37 }
 0x264   : > { %v726_v9 = vadd.f32 %v722_v2, %v714_v1  ;;  %v789_v24 = vmul.f32 %v787_v18, %v1945_v37  ;;  %v804_v25 = vmul.f32 %v803_v21, %v1940_v33  ;;  %v805_v29 = vmul.f32 %v803_v21, %v1945_v37 }
 0x265   : > { %v727_v13 = vadd.f32 %v723_v3, %v715_v5  ;;  %v796_v42 = vrot.slane %v792_v15, 1  ;;  %v797_v20 = vrot.slane %v793_v19, 1  ;;  %v816_v45 = vmul.f32 %v815_v22, %v1940_v33 }
 0x266   : > { %v738_v16 = vadd.f32 %v734_v4, %v726_v9  ;;  %v758_v46 = vrot.slane %v754_v7, 6  ;;  %v808_v47 = vrot.slane %v804_v25, 2  ;;  %v817_v21 = vmul.f32 %v815_v22, %v1945_v37 }
 0x267   : > { %v739_v41 = vadd.f32 %v735_v6, %v727_v13  ;;  %v800_v50 = vadd.f32 %v796_v42, %v788_v14  ;;  %v801_v51 = vadd.f32 %v797_v20, %v789_v24  ;;  %v809_v52 = vrot.slane %v805_v29, 2 }
 0x268   : > { %v750_v18 = vadd.f32 %v746_v10, %v738_v16  ;;  %v759_v53 = vrot.slane %v755_v8, 6  ;;  %v767_v55 = vmul.f32 %v765_v17, %v1945_v37  ;;  %v828_v22 = vmul.f32 %v827_v23, %v1940_v33 }
 0x269   : > { %v751_v49 = vadd.f32 %v747_v11, %v739_v41  ;;  %v770_v57 = vrot.slane %v766_v12, 7  ;;  %v812_v58 = vadd.f32 %v808_v47, %v800_v50  ;;  %v813_v59 = vadd.f32 %v809_v52, %v801_v51 }
 0x26a   : > { %v762_v54 = vadd.f32 %v758_v46, %v750_v18  ;;  %v820_v60 = vrot.slane %v816_v45, 3  ;;  %v821_v62 = vrot.slane %v817_v21, 3  ;;  %v829_v1 = vmul.f32 %v827_v23, %v1945_v37 }
 0x26b   : > { %v763_v61 = vadd.f32 %v759_v53, %v751_v49  ;;  %v840_v17 = vmul.f32 %v839_v26, %v1940_v33  ;;  %v832_v4 = vrot.slane %v828_v22, 4  ;;  %v841_v5 = vmul.f32 %v839_v26, %v1945_v37 }
 0x26c   : > { %v774_v2 = vadd.f32 %v770_v57, %v762_v54  ;;  %v824_v3 = vadd.f32 %v820_v60, %v812_v58  ;;  %v825_v6 = vadd.f32 %v821_v62, %v813_v59  ;;  %v1015_v7 = vstv %s1982_s17 }
 0x26d   : > { %v1027_v8 = vstv %s1993_s18  ;;  %v1039_v9 = vstv %s1995_s23  ;;  %v771_v23 = vrot.slane %v767_v55, 7  ;;  %v852_v11 = vmul.f32 %v851_v27, %v1940_v33 }
 0x26e   : > { %v836_v10 = vadd.f32 %v832_v4, %v824_v3  ;;  %v1051_v12 = vstv %s2000_s24  ;;  %v833_v13 = vrot.slane %v829_v1, 4  ;;  %v844_v14 = vrot.slane %v840_v17, 5 }
 0x26f   : > { %v975_v26 = vstv %s2005_s26  ;;  %v1063_v15 = vstv %s2007_s22  ;;  %v775_v19 = vadd.f32 %v771_v23, %v763_v61  ;;  %v2035_v16 = vadd.f32 %v777_v34, %v774_v2 }
 0x270   : > { %v845_v24 = vrot.slane %v841_v5, 5  ;;  %v853_v25 = vmul.f32 %v851_v27, %v1945_v37  ;;  %v837_v29 = vadd.f32 %v833_v13, %v825_v6  ;;  %v848_v41 = vadd.f32 %v844_v14, %v836_v10 }
 0x271   : > { %v864_v42 = vmul.f32 %v863_v28, %v1940_v33  ;;  %v892_v20 = vmul.f32 %v891_v31, %v1940_v33  ;;  %v856_v45 = vrot.slane %v852_v11, 6  ;;  %v865_v18 = vmul.f32 %v863_v28, %v1945_v37 }
 0x272   : > { %v888_v46 = vmul.f32 %v887_v30, %v1940_v33  ;;  %v893_v47 = vmul.f32 %v891_v31, %v1945_v37  ;;  %v904_v21 = vmul.f32 %v903_v32, %v1940_v33  ;;  %v905_v49 = vmul.f32 %v903_v32, %v1945_v37 }
 0x273   : > { %v896_v27 = vrot.slane %v892_v20, 1  ;;  %v916_v50 = vmul.f32 %v915_v35, %v1940_v33  ;;  %v857_v28 = vrot.slane %v853_v25, 6  ;;  %v889_v51 = vmul.f32 %v887_v30, %v1945_v37 }
 0x274   : > { %v897_v52 = vrot.slane %v893_v47, 1  ;;  %v917_v31 = vmul.f32 %v915_v35, %v1945_v37  ;;  %v849_v53 = vadd.f32 %v845_v24, %v837_v29  ;;  %v860_v54 = vadd.f32 %v856_v45, %v848_v41 }
 0x275   : > { %v900_v55 = vadd.f32 %v896_v27, %v888_v46  ;;  %v908_v22 = vrot.slane %v904_v21, 2  ;;  %v868_v32 = vrot.slane %v864_v42, 7  ;;  %v909_v58 = vrot.slane %v905_v49, 2 }
 0x276   : > { %v901_v57 = vadd.f32 %v897_v52, %v889_v51  ;;  %v920_v59 = vrot.slane %v916_v50, 3  ;;  %v928_v61 = vmul.f32 %v927_v36, %v1940_v33  ;;  %v929_v30 = vmul.f32 %v927_v36, %v1945_v37 }
 0x277   : > { %v912_v60 = vadd.f32 %v908_v22, %v900_v55  ;;  %v940_v35 = vmul.f32 %v939_v39, %v1940_v33  ;;  %v2081_v62 = vadd.f32 %v777_v34, %v775_v19  ;;  %v921_v17 = vrot.slane %v917_v31, 3 }
 0x278   : > { %v913_v1 = vadd.f32 %v909_v58, %v901_v57  ;;  %v941_v2 = vmul.f32 %v939_v39, %v1945_v37  ;;  %v861_v3 = vadd.f32 %v857_v28, %v849_v53  ;;  %v872_v4 = vadd.f32 %v868_v32, %v860_v54 }
 0x279   : > { %v924_v5 = vadd.f32 %v920_v59, %v912_v60  ;;  %v932_v6 = vrot.slane %v928_v61, 4  ;;  %v869_v23 = vrot.slane %v865_v18, 7  ;;  %v933_v10 = vrot.slane %v929_v30, 4 }
 0x27a   : > { %v925_v36 = vadd.f32 %v921_v17, %v913_v1  ;;  %v944_v11 = vrot.slane %v940_v35, 5  ;;  %v952_v34 = vmul.f32 %v951_v40, %v1940_v33  ;;  %v953_v14 = vmul.f32 %v951_v40, %v1945_v37 }
 0x27b   : > { %v936_v13 = vadd.f32 %v932_v6, %v924_v5  ;;  %v964_v39 = vmul.f32 %v963_v44, %v1940_v33  ;;  %v780_v19 = vmax.f32 %v2035_v16, 0.0  ;;  %v781_v24 = vmax.f32 %v2081_v62, 0.0 }
 0x27c   : > { %v937_v25 = vadd.f32 %v933_v10, %v925_v36  ;;  %v945_v29 = vrot.slane %v941_v2, 5  ;;  %v873_v41 = vadd.f32 %v869_v23, %v861_v3  ;;  %v876_v42 = vadd.f32 %v875_v43, %v872_v4 }
 0x27d   : > { %v948_v20 = vadd.f32 %v944_v11, %v936_v13  ;;  %v956_v40 = vrot.slane %v952_v34, 6  ;;  %v957_v18 = vrot.slane %v953_v14, 6  ;;  %v965_v16 = vmul.f32 %v963_v44, %v1945_v37 }
 0x27e   : > { %v949_v45 = vadd.f32 %v945_v29, %v937_v25  ;;  %v968_v46 = vrot.slane %v964_v39, 7  ;;  %v992_v27 = vmul.f32 %v991_v56, %v1940_v33  ;;  %v993_v21 = vmul.f32 %v991_v56, %v1945_v37 }
 0x27f   : > { %v960_v47 = vadd.f32 %v956_v40, %v948_v20  ;;  %v1004_v49 = vmul.f32 %v1003_v0, %v1940_v33  ;;  %v988_v28 = vmul.f32 %v987_v48, %v1940_v33  ;;  %v989_v44 = vmul.f32 %v987_v48, %v1945_v37 }
 0x280   : > { %v961_v50 = vadd.f32 %v957_v18, %v949_v45  ;;  %v1005_v51 = vmul.f32 %v1003_v0, %v1945_v37  ;;  %v996_v52 = vrot.slane %v992_v27, 1  ;;  %v997_v31 = vrot.slane %v993_v21, 1 }
 0x281   : > { %v1016_v56 = vmul.f32 %v1015_v7, %v1940_v33  ;;  %v1017_v53 = vmul.f32 %v1015_v7, %v1945_v37  ;;  %v877_v54 = vadd.f32 %v875_v43, %v873_v41  ;;  %v969_v55 = vrot.slane %v965_v16, 7 }
 0x282   : > { %v972_v22 = vadd.f32 %v968_v46, %v960_v47  ;;  %v1008_v32 = vrot.slane %v1004_v49, 2  ;;  %v1000_v48 = vadd.f32 %v996_v52, %v988_v28  ;;  %v1001_v57 = vadd.f32 %v997_v31, %v989_v44 }
 0x283   : > { %v1009_v58 = vrot.slane %v1005_v51, 2  ;;  %v1028_v0 = vmul.f32 %v1027_v8, %v1940_v33  ;;  %v973_v59 = vadd.f32 %v969_v55, %v961_v50  ;;  %v1029_v60 = vmul.f32 %v1027_v8, %v1945_v37 }
 0x284   : > { %v1040_v7 = vmul.f32 %v1039_v9, %v1940_v33  ;;  %v1041_v43 = vmul.f32 %v1039_v9, %v1945_v37  ;;  %v1012_v61 = vadd.f32 %v1008_v32, %v1000_v48  ;;  %v1020_v35 = vrot.slane %v1016_v56, 3 }
 0x285   : > { %v1013_v30 = vadd.f32 %v1009_v58, %v1001_v57  ;;  %v1021_v62 = vrot.slane %v1017_v53, 3  ;;  %v878_v1 = vmax.f32 %v876_v42, 0.0  ;;  %v879_v17 = vmax.f32 %v877_v54, 0.0 }
 0x286   : > { %v976_v8 = vadd.f32 %v975_v26, %v972_v22  ;;  %v1032_v2 = vrot.slane %v1028_v0, 4  ;;  %v1024_v9 = vadd.f32 %v1020_v35, %v1012_v61  ;;  %v1033_v4 = vrot.slane %v1029_v60, 4 }
 0x287   : > { %v1025_v3 = vadd.f32 %v1021_v62, %v1013_v30  ;;  %v1052_v5 = vmul.f32 %v1051_v12, %v1940_v33  ;;  %v977_v6 = vadd.f32 %v975_v26, %v973_v59  ;;  %v1044_v23 = vrot.slane %v1040_v7, 5 }
 0x288   : > { %v1045_v36 = vrot.slane %v1041_v43, 5  ;;  %v1053_v10 = vmul.f32 %v1051_v12, %v1945_v37  ;;  %v1036_v11 = vadd.f32 %v1032_v2, %v1024_v9  ;;  %v1064_v34 = vmul.f32 %v1063_v15, %v1940_v33 }
 0x289   : > { %v1037_v13 = vadd.f32 %v1033_v4, %v1025_v3  ;;  %v1065_v14 = vmul.f32 %v1063_v15, %v1945_v37  ;;  %v784_v39 = vmul.f32 %v783_v38, %v780_v19  ;;  %v785_v25 = vmul.f32 %v783_v38, %v781_v24 }
 0x28a   : > { %v882_v26 = vmul.f32 %v881_v63, %v878_v1  ;;  %v883_v29 = vmul.f32 %v881_v63, %v879_v17  ;;  %v1048_v12 = vadd.f32 %v1044_v23, %v1036_v11  ;;  %v1056_v42 = vrot.slane %v1052_v5, 6 }
 0x28b   : > { %v1049_v41 = vadd.f32 %v1045_v36, %v1037_v13  ;;  %v1057_v20 = vrot.slane %v1053_v10, 6  ;;  %v978_v33 = vmax.f32 %v976_v8, 0.0  ;;  %v979_v40 = vmax.f32 %v977_v6, 0.0 }
 0x28c   : > { %v1060_v45 = vadd.f32 %v1056_v42, %v1048_v12  ;;  %v1068_v15 = vrot.slane %v1064_v34, 7  ;;  %v1069_v19 = vrot.slane %v1065_v14, 7  ;;  %v981_v18 = vstv %s2140_s0 }
 0x28d   : > { %v1061_v37 = vadd.f32 %v1057_v20, %v1049_v41  ;;  %v1075_v38 = vstv %s2144_s1  ;;  %v884_v24 = vadd.f32 %v882_v26, %v784_v39  ;;  %v885_v16 = vadd.f32 %v883_v29, %v785_v25 }
 0x28e   : > { %v1072_v63 = vadd.f32 %v1068_v15, %v1060_v45  ;;  %v1594_v47 = vmov 1966171168   ;;  %v1096_v21 = vlaneseq  ;;  %v982_v49 = vmul.f32 %v981_v18, %v978_v33 }
 0x28f   : > { %v1073_v46 = vadd.f32 %v1069_v19, %v1061_v37  ;;  %v1094_v27 = vunpack.c.l.s4 %v1594_v47  ;;  %v983_v50 = vmul.f32 %v981_v18, %v979_v40  ;;  %v1081_v51 = vstv %s2168_s2 }
 0x290   : > { %v1076_v28 = vadd.f32 %v1075_v38, %v1072_v63  ;;  %v984_v52 = vadd.f32 %v982_v49, %v884_v24  ;;  %v1097_v32 = vshrl.u32 %v1096_v21, 7  ;;  %v1087_v48 = vstv %s1086_s3 }
 0x291   : > { %v1077_v44 = vadd.f32 %v1075_v38, %v1073_v46  ;;  %v985_v31 = vadd.f32 %v983_v50, %v885_v16  ;;  %v1095_v22 = vunpack.c.0.s8 %v1094_v27  ;;  %vm1110_vm3 = vcmp.lt.s32.totalorder %v1096_v21, 256 }
 0x292   : > { %v1078_v56 = vmax.f32 %v1076_v28, 0.0 }
 0x293   : > { %v1079_v53 = vmax.f32 %v1077_v44, 0.0  ;;  %v1098_v60 = vsub.s32 %v1095_v22, %v1097_v32 }
 0x294   : > { %v1082_v54 = vmul.f32 %v1081_v51, %v1078_v56 }
 0x295   : > { %v1083_v55 = vmul.f32 %v1081_v51, %v1079_v53 }
 0x296   : > { %v1084_v57 = vadd.f32 %v1082_v54, %v984_v52 }
 0x297   : > { %v1085_v58 = vadd.f32 %v1083_v55, %v985_v31 }
 0x298   : > { %v1088_v0 = vadd.f32 %v1087_v48, %v1084_v57 }
 0x299   : > { %v1089_v59 = vadd.f32 %v1087_v48, %v1085_v58 }
 0x29b   : > { %v1092_v7 = vcombine.low %v1088_v0, %v1089_v59 }
 0x29d   : > { %v1099_v43 = vrot.slane %v1092_v7, %v1098_v60 }
 0x29f   : > { %v1106_v61 = vrot.slane %v1099_v43, %v1098_v60 }
 0x2a1   : > { %1112 = vst.msk [vmem:[%s366_s6] sm:$0x3] %vm1110_vm3, %v1106_v61 }
 0x2a2   : > { %1530 = shalt.err (!%p1527_p6)
}
 0x2a3   : > { %s1531_s27 = scalar_lea.hbm %s2178_s14, 32  ;;  %s1535_s10 = scalar_lea.hbm %s2275_s16, 64 }
 0x2a4   : > { %p1532_p10 = scmp.ne.s32.totalorder %s2178_s14, %s1531_s27  ;;  %p1536_p11 = scmp.lt.u32.totalorder %s2178_s14, %s2275_s16 }
 0x2a5   : > { %p1537_p13 = scmp.lt.u32.totalorder %s1535_s10, %s1531_s27  ;;  %p1539_p1 = scmp.lt.u32.totalorder %s1531_s27, %s2178_s14 }
 0x2a6   : > { %p1533_p8 = pnand %p1532_p10, %p2276_p2 }
 0x2a7   : > { %p1538_p12 = por %p1537_p13, %p1536_p11 }
 0x2a8   : > { %p1534_p0 = pneg %p1533_p8 }
 0x2a9   : > { %p1540_p3 = por %p1539_p1, %p1538_p12 }
 0x2ab   : > { %p1541_p4 = pnand %p1540_p3, %p1534_p0 }
 0x2ad   : > { %1544 = shalt.err (!%p1541_p4)
}
 0x2ae   : > { %1409 = dma.vmem_to_hbm [thread:$0]  (%p2276_p2), %s2180_s7, 32, %s2178_s14, %s1114_s19  }
 0x2af PF: > { %s2277_s18 = sld [smem:[#allocation15_spill]]  ;;  %s2278_s23 = sld [smem:[#allocation13_spill]] }
 0x2b0   : > { %s2279_s24 = sld [smem:[#allocation18_spill]] }
 0x2b5   : > { %p1431_p9 = scmp.ge.s32.totalorder %s2277_s18, 2  ;;  %s1140_s26 = sand.u32 1, %s2278_s23  }
 0x2b6   : > { %p2280_p7 = scmp.ne.s32.totalorder %s2279_s24, 0  ;;  %s1141_s22 = scalar_lea.sflag [#allocation4], %s1140_s26 }
 0x2b8   : > { %p1422_p5 = pnand %p1431_p9, %p2280_p7 }
 0x2ba   : > { %1570 = dma.done.wait (!%p1422_p5), %s1141_s22, 32  }
 0x2bb   : > { %1572 = vsyncadd (!%p1422_p5), %s1141_s22, 4294967264  ;;  %s2281_s14 = sld [smem:[#allocation16_spill]]  ;;  %s2282_s0 = sld [smem:[#allocation14_spill]] }
 0x2bc   : > { %s2283_s13 = sld [smem:[#allocation17_spill]]  ;;  %s2284_s11 = smov %s1579_s12 }
 0x2c1   : > { %p22_p6 = scmp.ge.s32.totalorder %s2281_s14, 4   ;;  %s2285_s12 = smov %s2282_s0 }
 0x2c3   :  { %24 = sbr.rel (!%p22_p6) target bundleno = 16 (0x10), region = 104 }
 0x2ca   :  { %1146 = vsyncpa [#allocation4], 1 }
 0x2cb   :  { %1148 = vsyncpa [#allocation4 + $0x1], 1 }
 0x2cc   :  { %1149 = vsyncpa [#allocation5], 1 }
 0x2cd   :  { %1151 = vsyncpa [#allocation5 + $0x1], 1 }
 0x2ce   :  { %1152 = vsyncpa [#allocation7], 1 }

</bundles_post_ra>
